<compile_context>
chip_gen: v5e
topology: v5e:2x2
jax: 0.10.0
libtpu: 0.0.40
codegen_flags: <defaults>
</compile_context>

<pallas_src>
import functools

import jax
import jax.numpy as jnp
from jax.experimental import pallas as pl
from jax.experimental.pallas import tpu as pltpu

EPS = 1e-5


# ---------------------------------------------------------------------------
# Fused UpConv kernel (one batch element per grid step, everything in VMEM)
# ---------------------------------------------------------------------------
def upconv_kernel(x1_ref, x2_ref, uh_ref, uwc_ref, wr_ref, srt_ref, brt_ref,
                  band1a_ref, band1b_ref, s1t_ref, b1t_ref,
                  band2_ref, s2t_ref, b2t_ref,
                  o_ref, p2_ref, pu_ref, p1_ref,
                  *, h2, h1u, oy, ocol):
    """Layouts (all lane-dense 2-D slabs, channels innermost on the lane axis):

      x1_ref : (1, H1,  W1*C1)      x2_ref : (1, H2, W2*C2)
      uh_ref : (H1u, H1)            uwc_ref: (W1*Cmid, W1u*Cmid)   (bilinear matrices)
      wr_ref : (W1*C1, W1*Cmid)     (1x1 reduce conv, block-diag packed)
      band1a/band1b/band2 : (3, W*Cin, W*Cout)   (3x3 conv as 3 banded matmul slabs)
      s*t/b*t: (1, W*C)             (folded BN scale/bias, tiled per pixel column)
      o_ref  : (1, H2, W2*Cout)
      p2/pu/p1 : VMEM scratch planes with a 1-row halo on top/bottom.
    """
    f32 = jnp.float32

    # ---- 1) reduce: 1x1 conv + folded BN + ReLU (lane-dense (H1, W1*Cmid)) ----
    r = jnp.dot(x1_ref[0], wr_ref[...], preferred_element_type=f32)
    r = jnp.maximum(r * srt_ref[...] + brt_ref[...], 0.0)

    # ---- 2) bilinear upsample x2 (align_corners=True) as two small matmuls ----
    t = jnp.dot(uh_ref[...], r, preferred_element_type=f32)       # rows  (H1u, W1*Cmid)
    up = jnp.dot(t, uwc_ref[...], preferred_element_type=f32)     # cols  (H1u, W1u*Cmid)

    # ---- 3) halo padding + F.pad placement via zeroed VMEM scratch planes;
    #         the channel concat stays implicit (split conv1 weights). ----
    p2_ref[...] = jnp.zeros(p2_ref.shape, p2_ref.dtype)
    pu_ref[...] = jnp.zeros(pu_ref.shape, pu_ref.dtype)
    p2_ref[1:h2 + 1, :] = x2_ref[0]
    pu_ref[oy:oy + h1u, ocol:ocol + up.shape[1]] = up

    xp2 = p2_ref[...]
    xpu = pu_ref[...]

    # ---- 4) conv1 (3x3, pad=1) over concat([x2, up]) = 6 banded matmuls ----
    acc = jnp.zeros((h2, band1a_ref.shape[2]), f32)
    for dy in range(3):
        acc = acc + jnp.dot(xp2[dy:dy + h2, :], band1a_ref[dy],
                            preferred_element_type=f32)
        acc = acc + jnp.dot(xpu[dy:dy + h2, :], band1b_ref[dy],
                            preferred_element_type=f32)
    y1 = jnp.maximum(acc * s1t_ref[...] + b1t_ref[...], 0.0)      # (H2, W2*Cout)

    # ---- 5) conv2 (3x3, pad=1); intermediate never leaves VMEM ----
    p1_ref[...] = jnp.zeros(p1_ref.shape, p1_ref.dtype)
    p1_ref[1:h2 + 1, :] = y1
    xp1 = p1_ref[...]
    acc2 = jnp.zeros((h2, band2_ref.shape[2]), f32)
    for dy in range(3):
        acc2 = acc2 + jnp.dot(xp1[dy:dy + h2, :], band2_ref[dy],
                              preferred_element_type=f32)
    y2 = jnp.maximum(acc2 * s2t_ref[...] + b2t_ref[...], 0.0)

    # ---- 6) lane-dense store: last block dim is W2*Cout (= 128 here) ----
    o_ref[0] = y2.astype(o_ref.dtype)


# ---------------------------------------------------------------------------
# Wrapper: NCHW <-> lane-dense layout glue + pallas_call plumbing
# ---------------------------------------------------------------------------
@jax.jit
def upconv_forward(x1_nchw, x2_nchw, uh, uwc, wr, srt, brt,
                   band1a, band1b, s1t, b1t, band2, s2t, b2t):
    N, C1, H1, W1 = x1_nchw.shape
    _, C2, H2, W2 = x2_nchw.shape
    Cmid = uwc.shape[0] // W1
    Cout = band2.shape[2] // W2
    H1u = uh.shape[0]
    W1u = uwc.shape[1] // Cmid
    diffY, diffX = H2 - H1u, W2 - W1u
    # TODO(synk): negative diff (F.pad cropping when upsampled x1 > x2) not handled.

    x1 = jnp.transpose(x1_nchw, (0, 2, 3, 1)).reshape(N, H1, W1 * C1)
    x2 = jnp.transpose(x2_nchw, (0, 2, 3, 1)).reshape(N, H2, W2 * C2)

    kernel = functools.partial(upconv_kernel, h2=H2, h1u=H1u,
                               oy=1 + diffY // 2, ocol=(diffX // 2) * Cmid)

    out2d = pl.pallas_call(
        kernel,
        out_shape=jax.ShapeDtypeStruct((N, H2, W2 * Cout), x1_nchw.dtype),
        grid=(N,),
        in_specs=[
            pl.BlockSpec((1, H1, W1 * C1), lambda n: (n, 0, 0)),
            pl.BlockSpec((1, H2, W2 * C2), lambda n: (n, 0, 0)),
            pl.BlockSpec(uh.shape, lambda n: (0, 0)),
            pl.BlockSpec(uwc.shape, lambda n: (0, 0)),
            pl.BlockSpec(wr.shape, lambda n: (0, 0)),
            pl.BlockSpec(srt.shape, lambda n: (0, 0)),
            pl.BlockSpec(brt.shape, lambda n: (0, 0)),
            pl.BlockSpec(band1a.shape, lambda n: (0, 0, 0)),
            pl.BlockSpec(band1b.shape, lambda n: (0, 0, 0)),
            pl.BlockSpec(s1t.shape, lambda n: (0, 0)),
            pl.BlockSpec(b1t.shape, lambda n: (0, 0)),
            pl.BlockSpec(band2.shape, lambda n: (0, 0, 0)),
            pl.BlockSpec(s2t.shape, lambda n: (0, 0)),
            pl.BlockSpec(b2t.shape, lambda n: (0, 0)),
        ],
        out_specs=pl.BlockSpec((1, H2, W2 * Cout), lambda n: (n, 0, 0)),
        scratch_shapes=[
            pltpu.VMEM((H2 + 2, W2 * C2), jnp.float32),     # halo-padded x2 plane
            pltpu.VMEM((H2 + 2, W2 * Cmid), jnp.float32),   # halo/F.pad plane for up(x1)
            pltpu.VMEM((H2 + 2, W2 * Cout), jnp.float32),   # halo-padded conv1 output
        ],
        compiler_params=pltpu.CompilerParams(
            dimension_semantics=("parallel",)),
    )(x1, x2, uh, uwc, wr, srt, brt, band1a, band1b, s1t, b1t, band2, s2t, b2t)

    out = out2d.reshape(N, H2, W2, Cout)
    return jnp.transpose(out, (0, 3, 1, 2))                 # NHWC -> NCHW


# ---------------------------------------------------------------------------
# Host-side parameter construction / packing
# ---------------------------------------------------------------------------
def fold_bn(gamma, beta, mean, var, conv_bias):
    scale = gamma / jnp.sqrt(var + EPS)
    bias = beta - mean * scale + conv_bias * scale
    return scale, bias


def make_bn(key, c):
    kg, kb, km, kv = jax.random.split(key, 4)
    gamma = 1.0 + 0.1 * jax.random.normal(kg, (c,), jnp.float32)
    beta = 0.1 * jax.random.normal(kb, (c,), jnp.float32)
    mean = 0.1 * jax.random.normal(km, (c,), jnp.float32)
    var = jax.random.uniform(kv, (c,), jnp.float32, minval=0.5, maxval=1.5)
    return gamma, beta, mean, var


def make_conv_bn(key, cin, cout, ksize):
    kw, kb, kbn = jax.random.split(key, 3)
    w = 0.1 * jax.random.normal(kw, (cout, cin, ksize, ksize), jnp.float32)  # OIHW
    b = 0.1 * jax.random.normal(kb, (cout,), jnp.float32)
    scale, bias = fold_bn(*make_bn(kbn, cout), b)
    w_hwio = jnp.transpose(w, (2, 3, 1, 0))                                  # HWIO
    return w_hwio, scale, bias


def bilinear_matrix(n_in, n_out):
    """1-D interpolation matrix of nn.Upsample(mode='bilinear', align_corners=True)."""
    if n_out == 1:
        src = jnp.zeros((1,), jnp.float32)
    else:
        src = jnp.arange(n_out, dtype=jnp.float32) * ((n_in - 1) / (n_out - 1))
    i0 = jnp.clip(jnp.floor(src).astype(jnp.int32), 0, n_in - 1)
    i1 = jnp.clip(i0 + 1, 0, n_in - 1)
    frac = src - i0.astype(jnp.float32)
    rows = jnp.arange(n_out)
    m = jnp.zeros((n_out, n_in), jnp.float32)
    m = m.at[rows, i0].add(1.0 - frac)
    m = m.at[rows, i1].add(frac)
    return m


def band_matrices(w_hwio, width):
    """Pack a 3x3 (pad=1, stride=1) conv as 3 banded (W*Cin, W*Cout) matmul slabs.

    B[dy][wi*Cin + c, w*Cout + o] = w_hwio[dy, wi - w + 1, c, o]  (zero off-band),
    so conv(x)[h] = sum_dy  xpad[h+dy, :] @ B[dy]  on the (H, W*C) lane-dense layout
    (W-boundary zero padding falls out of the band clipping).
    """
    kh, kw, cin, cout = w_hwio.shape
    mats = []
    for dy in range(kh):
        b = jnp.zeros((width * cin, width * cout), jnp.float32)
        for dx in range(kw):
            shift = jnp.eye(width, k=1 - dx, dtype=jnp.float32)  # row (w+dx-1) -> out col w
            b = b + jnp.kron(shift, w_hwio[dy, dx])
        mats.append(b)
    return jnp.stack(mats)


# ---------------------------------------------------------------------------
# Pure-JAX reference (same eval-mode folded BN), used only for a sanity check
# ---------------------------------------------------------------------------
def upconv_reference(x1_nchw, x2_nchw, wr_hwio, sr, br, uh, uw,
                     w1_hwio, s1, b1, w2_hwio, s2, b2):
    x1 = jnp.transpose(x1_nchw, (0, 2, 3, 1))
    x2 = jnp.transpose(x2_nchw, (0, 2, 3, 1))
    r = jnp.einsum('nhwc,cd->nhwd', x1, wr_hwio[0, 0])
    r = jnp.maximum(r * sr + br, 0.0)
    up = jnp.einsum('ph,nhwc->npwc', uh, r)
    up = jnp.einsum('qw,npwc->npqc', uw, up)
    dh = x2.shape[1] - up.shape[1]
    dw = x2.shape[2] - up.shape[2]
    up = jnp.pad(up, ((0, 0), (dh // 2, dh - dh // 2), (dw // 2, dw - dw // 2), (0, 0)))
    cat = jnp.concatenate([x2, up], axis=-1)

    def conv_bn_relu(x, w, s, b):
        y = jax.lax.conv_general_dilated(
            x, w, window_strides=(1, 1), padding=((1, 1), (1, 1)),
            dimension_numbers=('NHWC', 'HWIO', 'NHWC'))
        return jnp.maximum(y * s + b, 0.0)

    y = conv_bn_relu(cat, w1_hwio, s1, b1)
    y = conv_bn_relu(y, w2_hwio, s2, b2)
    return jnp.transpose(y, (0, 3, 1, 2))


if __name__ == "__main__":
    N = 2
    IN_CH = 8                  # x1 channels (UpConv in_channels)
    SKIP_CH = IN_CH // 2       # x2 (skip connection) channels
    MID_CH = IN_CH // 2        # after the 1x1 reduce
    OUT_CH = 8
    H1 = W1 = 8                # x1 spatial
    H2 = W2 = 16               # x2 spatial

    key = jax.random.PRNGKey(0)
    kx1, kx2, kr, kc1, kc2 = jax.random.split(key, 5)
    x1 = jax.random.normal(kx1, (N, IN_CH, H1, W1), jnp.float32)     # NCHW like PyTorch
    x2 = jax.random.normal(kx2, (N, SKIP_CH, H2, W2), jnp.float32)

    # module parameters (deterministic, eval-mode BN folded)
    wr_hwio, sr, br = make_conv_bn(kr, IN_CH, MID_CH, 1)             # Conv1x1BNReLU
    w1_hwio, s1, b1 = make_conv_bn(kc1, SKIP_CH + MID_CH, OUT_CH, 3)  # DoubleConv conv1
    w2_hwio, s2, b2 = make_conv_bn(kc2, OUT_CH, OUT_CH, 3)            # DoubleConv conv2

    # host-side packing for the fused lane-dense kernel (all tiny)
    uh = bilinear_matrix(H1, 2 * H1)                                  # (2H1, H1)
    uw = bilinear_matrix(W1, 2 * W1)                                  # (2W1, W1)
    uwc = jnp.kron(uw.T, jnp.eye(MID_CH, dtype=jnp.float32))          # width interp, per-channel
    wr = jnp.kron(jnp.eye(W1, dtype=jnp.float32), wr_hwio[0, 0])      # 1x1 conv, block-diag
    srt = jnp.tile(sr, W1).reshape(1, -1)
    brt = jnp.tile(br, W1).reshape(1, -1)
    b1a = band_matrices(w1_hwio[:, :, :SKIP_CH, :], W2)               # conv1, x2 channel block
    b1b = band_matrices(w1_hwio[:, :, SKIP_CH:, :], W2)               # conv1, upsampled-x1 block
    s1t = jnp.tile(s1, W2).reshape(1, -1)
    b1t = jnp.tile(b1, W2).reshape(1, -1)
    b2m = band_matrices(w2_hwio, W2)                                  # conv2
    s2t = jnp.tile(s2, W2).reshape(1, -1)
    b2t = jnp.tile(b2, W2).reshape(1, -1)

    out = upconv_forward(x1, x2, uh, uwc, wr, srt, brt,
                         b1a, b1b, s1t, b1t, b2m, s2t, b2t)
    out = jax.block_until_ready(out)
    assert out.shape == (N, OUT_CH, H2, W2), out.shape

    ref = upconv_reference(x1, x2, wr_hwio, sr, br, uh, uw,
                           w1_hwio, s1, b1, w2_hwio, s2, b2)
    err = float(jnp.max(jnp.abs(out - ref)))
    assert err < 5e-2, f"max abs error vs reference: {err}"
    print("KERNEL_OK")
</pallas_src>

<mosaic_0001>
module attributes {stable_mosaic.version = 11 : i64} {
  func.func @upconv_kernel(%arg0: i32, %arg1: memref<1x8x64xf32, #tpu.memory_space<vmem>>, %arg2: memref<1x16x64xf32, #tpu.memory_space<vmem>>, %arg3: memref<16x8xf32, #tpu.memory_space<vmem>>, %arg4: memref<32x64xf32, #tpu.memory_space<vmem>>, %arg5: memref<64x32xf32, #tpu.memory_space<vmem>>, %arg6: memref<1x32xf32, #tpu.memory_space<vmem>>, %arg7: memref<1x32xf32, #tpu.memory_space<vmem>>, %arg8: memref<3x64x128xf32, #tpu.memory_space<vmem>>, %arg9: memref<3x64x128xf32, #tpu.memory_space<vmem>>, %arg10: memref<1x128xf32, #tpu.memory_space<vmem>>, %arg11: memref<1x128xf32, #tpu.memory_space<vmem>>, %arg12: memref<3x128x128xf32, #tpu.memory_space<vmem>>, %arg13: memref<1x128xf32, #tpu.memory_space<vmem>>, %arg14: memref<1x128xf32, #tpu.memory_space<vmem>>, %arg15: memref<1x16x128xf32, #tpu.memory_space<vmem>>, %arg16: memref<18x64xf32, #tpu.memory_space<vmem>>, %arg17: memref<18x64xf32, #tpu.memory_space<vmem>>, %arg18: memref<18x128xf32, #tpu.memory_space<vmem>>) attributes {dimension_semantics = [#tpu.dimension_semantics<parallel>], iteration_bounds = array<i64: 2>, scalar_prefetch = 0 : i64, scratch_operands = 3 : i64, tpu.core_type = #tpu.core_type<tc>, window_params = [{transform_indices = @transform_0, window_bounds = array<i64: 1, 8, 64>}, {transform_indices = @transform_1, window_bounds = array<i64: 1, 16, 64>}, {pipeline_mode = #tpu.pipeline_mode<synchronous>, transform_indices = @transform_2, window_bounds = array<i64: 16, 8>}, {pipeline_mode = #tpu.pipeline_mode<synchronous>, transform_indices = @transform_3, window_bounds = array<i64: 32, 64>}, {pipeline_mode = #tpu.pipeline_mode<synchronous>, transform_indices = @transform_4, window_bounds = array<i64: 64, 32>}, {pipeline_mode = #tpu.pipeline_mode<synchronous>, transform_indices = @transform_5, window_bounds = array<i64: 1, 32>}, {pipeline_mode = #tpu.pipeline_mode<synchronous>, transform_indices = @transform_6, window_bounds = array<i64: 1, 32>}, {pipeline_mode = #tpu.pipeline_mode<synchronous>, transform_indices = @transform_7, window_bounds = array<i64: 3, 64, 128>}, {pipeline_mode = #tpu.pipeline_mode<synchronous>, transform_indices = @transform_8, window_bounds = array<i64: 3, 64, 128>}, {pipeline_mode = #tpu.pipeline_mode<synchronous>, transform_indices = @transform_9, window_bounds = array<i64: 1, 128>}, {pipeline_mode = #tpu.pipeline_mode<synchronous>, transform_indices = @transform_10, window_bounds = array<i64: 1, 128>}, {pipeline_mode = #tpu.pipeline_mode<synchronous>, transform_indices = @transform_11, window_bounds = array<i64: 3, 128, 128>}, {pipeline_mode = #tpu.pipeline_mode<synchronous>, transform_indices = @transform_12, window_bounds = array<i64: 1, 128>}, {pipeline_mode = #tpu.pipeline_mode<synchronous>, transform_indices = @transform_13, window_bounds = array<i64: 1, 128>}, {transform_indices = @transform_14, window_bounds = array<i64: 1, 16, 128>}]} {
    %c0 = arith.constant 0 : index
    %c0_0 = arith.constant 0 : index
    %c0_1 = arith.constant 0 : index
    %0 = vector.load %arg1[%c0, %c0_0, %c0_1] : memref<1x8x64xf32, #tpu.memory_space<vmem>>, vector<1x8x64xf32>
    %1 = vector.shape_cast %0 : vector<1x8x64xf32> to vector<8x64xf32>
    %c0_2 = arith.constant 0 : index
    %c0_3 = arith.constant 0 : index
    %2 = vector.load %arg5[%c0_2, %c0_3] : memref<64x32xf32, #tpu.memory_space<vmem>>, vector<64x32xf32>
    %cst = arith.constant dense<0.000000e+00> : vector<8x32xf32>
    %3 = tpu.matmul %1, %2, %cst {dimension_numbers = #tpu.dot_dimension_numbers<[1], [0], [0], [1], [0, 0, 1, 1], [], []>} : vector<8x64xf32>, vector<64x32xf32>, vector<8x32xf32> -> vector<8x32xf32>
    %c0_4 = arith.constant 0 : index
    %c0_5 = arith.constant 0 : index
    %4 = vector.load %arg6[%c0_4, %c0_5] : memref<1x32xf32, #tpu.memory_space<vmem>>, vector<1x32xf32>
    %5 = vector.broadcast %4 : vector<1x32xf32> to vector<8x32xf32>
    %6 = arith.mulf %3, %5 : vector<8x32xf32>
    %c0_6 = arith.constant 0 : index
    %c0_7 = arith.constant 0 : index
    %7 = vector.load %arg7[%c0_6, %c0_7] : memref<1x32xf32, #tpu.memory_space<vmem>>, vector<1x32xf32>
    %8 = vector.broadcast %7 : vector<1x32xf32> to vector<8x32xf32>
    %9 = arith.addf %6, %8 : vector<8x32xf32>
    %cst_8 = arith.constant 0.000000e+00 : f32
    %10 = vector.broadcast %cst_8 : f32 to vector<8x32xf32>
    %11 = arith.maximumf %9, %10 : vector<8x32xf32>
    %c0_9 = arith.constant 0 : index
    %c0_10 = arith.constant 0 : index
    %12 = vector.load %arg3[%c0_9, %c0_10] : memref<16x8xf32, #tpu.memory_space<vmem>>, vector<16x8xf32>
    %cst_11 = arith.constant dense<0.000000e+00> : vector<16x32xf32>
    %13 = tpu.matmul %12, %11, %cst_11 {dimension_numbers = #tpu.dot_dimension_numbers<[1], [0], [0], [1], [0, 0, 1, 1], [], []>} : vector<16x8xf32>, vector<8x32xf32>, vector<16x32xf32> -> vector<16x32xf32>
    %c0_12 = arith.constant 0 : index
    %c0_13 = arith.constant 0 : index
    %14 = vector.load %arg4[%c0_12, %c0_13] : memref<32x64xf32, #tpu.memory_space<vmem>>, vector<32x64xf32>
    %cst_14 = arith.constant dense<0.000000e+00> : vector<16x64xf32>
    %15 = tpu.matmul %13, %14, %cst_14 {dimension_numbers = #tpu.dot_dimension_numbers<[1], [0], [0], [1], [0, 0, 1, 1], [], []>} : vector<16x32xf32>, vector<32x64xf32>, vector<16x64xf32> -> vector<16x64xf32>
    %cst_15 = arith.constant 0.000000e+00 : f32
    %16 = vector.broadcast %cst_15 : f32 to vector<18x64xf32>
    %c0_16 = arith.constant 0 : index
    %c0_17 = arith.constant 0 : index
    %17 = vector.load %arg16[%c0_16, %c0_17] : memref<18x64xf32, #tpu.memory_space<vmem>>, vector<18x64xf32>
    tpu.vector_store %arg16[%c0_16, %c0_17], %16 {strides = array<i32>} : memref<18x64xf32, #tpu.memory_space<vmem>>, vector<18x64xf32>,
    %cst_18 = arith.constant 0.000000e+00 : f32
    %18 = vector.broadcast %cst_18 : f32 to vector<18x64xf32>
    %c0_19 = arith.constant 0 : index
    %c0_20 = arith.constant 0 : index
    %19 = vector.load %arg17[%c0_19, %c0_20] : memref<18x64xf32, #tpu.memory_space<vmem>>, vector<18x64xf32>
    tpu.vector_store %arg17[%c0_19, %c0_20], %18 {strides = array<i32>} : memref<18x64xf32, #tpu.memory_space<vmem>>, vector<18x64xf32>,
    %c0_21 = arith.constant 0 : index
    %c0_22 = arith.constant 0 : index
    %c0_23 = arith.constant 0 : index
    %20 = vector.load %arg2[%c0_21, %c0_22, %c0_23] : memref<1x16x64xf32, #tpu.memory_space<vmem>>, vector<1x16x64xf32>
    %21 = vector.shape_cast %20 : vector<1x16x64xf32> to vector<16x64xf32>
    %c1 = arith.constant 1 : index
    %c0_24 = arith.constant 0 : index
    %22 = vector.load %arg16[%c1, %c0_24] : memref<18x64xf32, #tpu.memory_space<vmem>>, vector<16x64xf32>
    tpu.vector_store %arg16[%c1, %c0_24], %21 {strides = array<i32>} : memref<18x64xf32, #tpu.memory_space<vmem>>, vector<16x64xf32>,
    %c1_25 = arith.constant 1 : index
    %c0_26 = arith.constant 0 : index
    %23 = vector.load %arg17[%c1_25, %c0_26] : memref<18x64xf32, #tpu.memory_space<vmem>>, vector<16x64xf32>
    tpu.vector_store %arg17[%c1_25, %c0_26], %15 {strides = array<i32>} : memref<18x64xf32, #tpu.memory_space<vmem>>, vector<16x64xf32>,
    %c0_27 = arith.constant 0 : index
    %c0_28 = arith.constant 0 : index
    %24 = vector.load %arg16[%c0_27, %c0_28] : memref<18x64xf32, #tpu.memory_space<vmem>>, vector<18x64xf32>
    %c0_29 = arith.constant 0 : index
    %c0_30 = arith.constant 0 : index
    %25 = vector.load %arg17[%c0_29, %c0_30] : memref<18x64xf32, #tpu.memory_space<vmem>>, vector<18x64xf32>
    %cst_31 = arith.constant 0.000000e+00 : f32
    %26 = vector.broadcast %cst_31 : f32 to vector<16x128xf32>
    %27 = vector.extract_strided_slice %24 {offsets = [0, 0], sizes = [16, 64], strides = [1, 1]} : vector<18x64xf32> to vector<16x64xf32>
    %c0_32 = arith.constant 0 : index
    %c0_33 = arith.constant 0 : index
    %c0_34 = arith.constant 0 : index
    %28 = vector.load %arg8[%c0_32, %c0_33, %c0_34] : memref<3x64x128xf32, #tpu.memory_space<vmem>>, vector<1x64x128xf32>
    %29 = vector.shape_cast %28 : vector<1x64x128xf32> to vector<64x128xf32>
    %cst_35 = arith.constant dense<0.000000e+00> : vector<16x128xf32>
    %30 = tpu.matmul %27, %29, %cst_35 {dimension_numbers = #tpu.dot_dimension_numbers<[1], [0], [0], [1], [0, 0, 1, 1], [], []>} : vector<16x64xf32>, vector<64x128xf32>, vector<16x128xf32> -> vector<16x128xf32>
    %31 = arith.addf %26, %30 : vector<16x128xf32>
    %32 = vector.extract_strided_slice %25 {offsets = [0, 0], sizes = [16, 64], strides = [1, 1]} : vector<18x64xf32> to vector<16x64xf32>
    %c0_36 = arith.constant 0 : index
    %c0_37 = arith.constant 0 : index
    %c0_38 = arith.constant 0 : index
    %33 = vector.load %arg9[%c0_36, %c0_37, %c0_38] : memref<3x64x128xf32, #tpu.memory_space<vmem>>, vector<1x64x128xf32>
    %34 = vector.shape_cast %33 : vector<1x64x128xf32> to vector<64x128xf32>
    %cst_39 = arith.constant dense<0.000000e+00> : vector<16x128xf32>
    %35 = tpu.matmul %32, %34, %cst_39 {dimension_numbers = #tpu.dot_dimension_numbers<[1], [0], [0], [1], [0, 0, 1, 1], [], []>} : vector<16x64xf32>, vector<64x128xf32>, vector<16x128xf32> -> vector<16x128xf32>
    %36 = arith.addf %31, %35 : vector<16x128xf32>
    %37 = vector.extract_strided_slice %24 {offsets = [1, 0], sizes = [16, 64], strides = [1, 1]} : vector<18x64xf32> to vector<16x64xf32>
    %c1_40 = arith.constant 1 : index
    %c0_41 = arith.constant 0 : index
    %c0_42 = arith.constant 0 : index
    %38 = vector.load %arg8[%c1_40, %c0_41, %c0_42] : memref<3x64x128xf32, #tpu.memory_space<vmem>>, vector<1x64x128xf32>
    %39 = vector.shape_cast %38 : vector<1x64x128xf32> to vector<64x128xf32>
    %cst_43 = arith.constant dense<0.000000e+00> : vector<16x128xf32>
    %40 = tpu.matmul %37, %39, %cst_43 {dimension_numbers = #tpu.dot_dimension_numbers<[1], [0], [0], [1], [0, 0, 1, 1], [], []>} : vector<16x64xf32>, vector<64x128xf32>, vector<16x128xf32> -> vector<16x128xf32>
    %41 = arith.addf %36, %40 : vector<16x128xf32>
    %42 = vector.extract_strided_slice %25 {offsets = [1, 0], sizes = [16, 64], strides = [1, 1]} : vector<18x64xf32> to vector<16x64xf32>
    %c1_44 = arith.constant 1 : index
    %c0_45 = arith.constant 0 : index
    %c0_46 = arith.constant 0 : index
    %43 = vector.load %arg9[%c1_44, %c0_45, %c0_46] : memref<3x64x128xf32, #tpu.memory_space<vmem>>, vector<1x64x128xf32>
    %44 = vector.shape_cast %43 : vector<1x64x128xf32> to vector<64x128xf32>
    %cst_47 = arith.constant dense<0.000000e+00> : vector<16x128xf32>
    %45 = tpu.matmul %42, %44, %cst_47 {dimension_numbers = #tpu.dot_dimension_numbers<[1], [0], [0], [1], [0, 0, 1, 1], [], []>} : vector<16x64xf32>, vector<64x128xf32>, vector<16x128xf32> -> vector<16x128xf32>
    %46 = arith.addf %41, %45 : vector<16x128xf32>
    %47 = vector.extract_strided_slice %24 {offsets = [2, 0], sizes = [16, 64], strides = [1, 1]} : vector<18x64xf32> to vector<16x64xf32>
    %c2 = arith.constant 2 : index
    %c0_48 = arith.constant 0 : index
    %c0_49 = arith.constant 0 : index
    %48 = vector.load %arg8[%c2, %c0_48, %c0_49] : memref<3x64x128xf32, #tpu.memory_space<vmem>>, vector<1x64x128xf32>
    %49 = vector.shape_cast %48 : vector<1x64x128xf32> to vector<64x128xf32>
    %cst_50 = arith.constant dense<0.000000e+00> : vector<16x128xf32>
    %50 = tpu.matmul %47, %49, %cst_50 {dimension_numbers = #tpu.dot_dimension_numbers<[1], [0], [0], [1], [0, 0, 1, 1], [], []>} : vector<16x64xf32>, vector<64x128xf32>, vector<16x128xf32> -> vector<16x128xf32>
    %51 = arith.addf %46, %50 : vector<16x128xf32>
    %52 = vector.extract_strided_slice %25 {offsets = [2, 0], sizes = [16, 64], strides = [1, 1]} : vector<18x64xf32> to vector<16x64xf32>
    %c2_51 = arith.constant 2 : index
    %c0_52 = arith.constant 0 : index
    %c0_53 = arith.constant 0 : index
    %53 = vector.load %arg9[%c2_51, %c0_52, %c0_53] : memref<3x64x128xf32, #tpu.memory_space<vmem>>, vector<1x64x128xf32>
    %54 = vector.shape_cast %53 : vector<1x64x128xf32> to vector<64x128xf32>
    %cst_54 = arith.constant dense<0.000000e+00> : vector<16x128xf32>
    %55 = tpu.matmul %52, %54, %cst_54 {dimension_numbers = #tpu.dot_dimension_numbers<[1], [0], [0], [1], [0, 0, 1, 1], [], []>} : vector<16x64xf32>, vector<64x128xf32>, vector<16x128xf32> -> vector<16x128xf32>
    %56 = arith.addf %51, %55 : vector<16x128xf32>
    %c0_55 = arith.constant 0 : index
    %c0_56 = arith.constant 0 : index
    %57 = vector.load %arg10[%c0_55, %c0_56] : memref<1x128xf32, #tpu.memory_space<vmem>>, vector<1x128xf32>
    %58 = vector.broadcast %57 : vector<1x128xf32> to vector<16x128xf32>
    %59 = arith.mulf %56, %58 : vector<16x128xf32>
    %c0_57 = arith.constant 0 : index
    %c0_58 = arith.constant 0 : index
    %60 = vector.load %arg11[%c0_57, %c0_58] : memref<1x128xf32, #tpu.memory_space<vmem>>, vector<1x128xf32>
    %61 = vector.broadcast %60 : vector<1x128xf32> to vector<16x128xf32>
    %62 = arith.addf %59, %61 : vector<16x128xf32>
    %cst_59 = arith.constant 0.000000e+00 : f32
    %63 = vector.broadcast %cst_59 : f32 to vector<16x128xf32>
    %64 = arith.maximumf %62, %63 : vector<16x128xf32>
    %cst_60 = arith.constant 0.000000e+00 : f32
    %65 = vector.broadcast %cst_60 : f32 to vector<18x128xf32>
    %c0_61 = arith.constant 0 : index
    %c0_62 = arith.constant 0 : index
    %66 = vector.load %arg18[%c0_61, %c0_62] : memref<18x128xf32, #tpu.memory_space<vmem>>, vector<18x128xf32>
    tpu.vector_store %arg18[%c0_61, %c0_62], %65 {strides = array<i32>} : memref<18x128xf32, #tpu.memory_space<vmem>>, vector<18x128xf32>,
    %c1_63 = arith.constant 1 : index
    %c0_64 = arith.constant 0 : index
    %67 = vector.load %arg18[%c1_63, %c0_64] : memref<18x128xf32, #tpu.memory_space<vmem>>, vector<16x128xf32>
    tpu.vector_store %arg18[%c1_63, %c0_64], %64 {strides = array<i32>} : memref<18x128xf32, #tpu.memory_space<vmem>>, vector<16x128xf32>,
    %c0_65 = arith.constant 0 : index
    %c0_66 = arith.constant 0 : index
    %68 = vector.load %arg18[%c0_65, %c0_66] : memref<18x128xf32, #tpu.memory_space<vmem>>, vector<18x128xf32>
    %cst_67 = arith.constant 0.000000e+00 : f32
    %69 = vector.broadcast %cst_67 : f32 to vector<16x128xf32>
    %70 = vector.extract_strided_slice %68 {offsets = [0, 0], sizes = [16, 128], strides = [1, 1]} : vector<18x128xf32> to vector<16x128xf32>
    %c0_68 = arith.constant 0 : index
    %c0_69 = arith.constant 0 : index
    %c0_70 = arith.constant 0 : index
    %71 = vector.load %arg12[%c0_68, %c0_69, %c0_70] : memref<3x128x128xf32, #tpu.memory_space<vmem>>, vector<1x128x128xf32>
    %72 = vector.shape_cast %71 : vector<1x128x128xf32> to vector<128x128xf32>
    %cst_71 = arith.constant dense<0.000000e+00> : vector<16x128xf32>
    %73 = tpu.matmul %70, %72, %cst_71 {dimension_numbers = #tpu.dot_dimension_numbers<[1], [0], [0], [1], [0, 0, 1, 1], [], []>} : vector<16x128xf32>, vector<128x128xf32>, vector<16x128xf32> -> vector<16x128xf32>
    %74 = arith.addf %69, %73 : vector<16x128xf32>
    %75 = vector.extract_strided_slice %68 {offsets = [1, 0], sizes = [16, 128], strides = [1, 1]} : vector<18x128xf32> to vector<16x128xf32>
    %c1_72 = arith.constant 1 : index
    %c0_73 = arith.constant 0 : index
    %c0_74 = arith.constant 0 : index
    %76 = vector.load %arg12[%c1_72, %c0_73, %c0_74] : memref<3x128x128xf32, #tpu.memory_space<vmem>>, vector<1x128x128xf32>
    %77 = vector.shape_cast %76 : vector<1x128x128xf32> to vector<128x128xf32>
    %cst_75 = arith.constant dense<0.000000e+00> : vector<16x128xf32>
    %78 = tpu.matmul %75, %77, %cst_75 {dimension_numbers = #tpu.dot_dimension_numbers<[1], [0], [0], [1], [0, 0, 1, 1], [], []>} : vector<16x128xf32>, vector<128x128xf32>, vector<16x128xf32> -> vector<16x128xf32>
    %79 = arith.addf %74, %78 : vector<16x128xf32>
    %80 = vector.extract_strided_slice %68 {offsets = [2, 0], sizes = [16, 128], strides = [1, 1]} : vector<18x128xf32> to vector<16x128xf32>
    %c2_76 = arith.constant 2 : index
    %c0_77 = arith.constant 0 : index
    %c0_78 = arith.constant 0 : index
    %81 = vector.load %arg12[%c2_76, %c0_77, %c0_78] : memref<3x128x128xf32, #tpu.memory_space<vmem>>, vector<1x128x128xf32>
    %82 = vector.shape_cast %81 : vector<1x128x128xf32> to vector<128x128xf32>
    %cst_79 = arith.constant dense<0.000000e+00> : vector<16x128xf32>
    %83 = tpu.matmul %80, %82, %cst_79 {dimension_numbers = #tpu.dot_dimension_numbers<[1], [0], [0], [1], [0, 0, 1, 1], [], []>} : vector<16x128xf32>, vector<128x128xf32>, vector<16x128xf32> -> vector<16x128xf32>
    %84 = arith.addf %79, %83 : vector<16x128xf32>
    %c0_80 = arith.constant 0 : index
    %c0_81 = arith.constant 0 : index
    %85 = vector.load %arg13[%c0_80, %c0_81] : memref<1x128xf32, #tpu.memory_space<vmem>>, vector<1x128xf32>
    %86 = vector.broadcast %85 : vector<1x128xf32> to vector<16x128xf32>
    %87 = arith.mulf %84, %86 : vector<16x128xf32>
    %c0_82 = arith.constant 0 : index
    %c0_83 = arith.constant 0 : index
    %88 = vector.load %arg14[%c0_82, %c0_83] : memref<1x128xf32, #tpu.memory_space<vmem>>, vector<1x128xf32>
    %89 = vector.broadcast %88 : vector<1x128xf32> to vector<16x128xf32>
    %90 = arith.addf %87, %89 : vector<16x128xf32>
    %cst_84 = arith.constant 0.000000e+00 : f32
    %91 = vector.broadcast %cst_84 : f32 to vector<16x128xf32>
    %92 = arith.maximumf %90, %91 : vector<16x128xf32>
    %c0_85 = arith.constant 0 : index
    %c0_86 = arith.constant 0 : index
    %c0_87 = arith.constant 0 : index
    %93 = vector.load %arg15[%c0_85, %c0_86, %c0_87] : memref<1x16x128xf32, #tpu.memory_space<vmem>>, vector<1x16x128xf32>
    %94 = vector.shape_cast %93 : vector<1x16x128xf32> to vector<16x128xf32>
    %95 = vector.shape_cast %92 : vector<16x128xf32> to vector<1x16x128xf32>
    tpu.vector_store %arg15[%c0_85, %c0_86, %c0_87], %95 {strides = array<i32>} : memref<1x16x128xf32, #tpu.memory_space<vmem>>, vector<1x16x128xf32>,
    return
  }
  func.func @transform_0(%arg0: i32) -> (i32, i32, i32) {
    %c0_i32 = arith.constant 0 : i32
    %c0_i32_0 = arith.constant 0 : i32
    %c0_i32_1 = arith.constant 0 : i32
    return %arg0, %c0_i32, %c0_i32_0 : i32, i32, i32
  }
  func.func @transform_1(%arg0: i32) -> (i32, i32, i32) {
    %c0_i32 = arith.constant 0 : i32
    %c0_i32_0 = arith.constant 0 : i32
    %c0_i32_1 = arith.constant 0 : i32
    return %arg0, %c0_i32, %c0_i32_0 : i32, i32, i32
  }
  func.func @transform_2(%arg0: i32) -> (i32, i32) {
    %c0_i32 = arith.constant 0 : i32
    %c0_i32_0 = arith.constant 0 : i32
    %c0_i32_1 = arith.constant 0 : i32
    return %c0_i32, %c0_i32_0 : i32, i32
  }
  func.func @transform_3(%arg0: i32) -> (i32, i32) {
    %c0_i32 = arith.constant 0 : i32
    %c0_i32_0 = arith.constant 0 : i32
    %c0_i32_1 = arith.constant 0 : i32
    return %c0_i32, %c0_i32_0 : i32, i32
  }
  func.func @transform_4(%arg0: i32) -> (i32, i32) {
    %c0_i32 = arith.constant 0 : i32
    %c0_i32_0 = arith.constant 0 : i32
    %c0_i32_1 = arith.constant 0 : i32
    return %c0_i32, %c0_i32_0 : i32, i32
  }
  func.func @transform_5(%arg0: i32) -> (i32, i32) {
    %c0_i32 = arith.constant 0 : i32
    %c0_i32_0 = arith.constant 0 : i32
    %c0_i32_1 = arith.constant 0 : i32
    return %c0_i32, %c0_i32_0 : i32, i32
  }
  func.func @transform_6(%arg0: i32) -> (i32, i32) {
    %c0_i32 = arith.constant 0 : i32
    %c0_i32_0 = arith.constant 0 : i32
    %c0_i32_1 = arith.constant 0 : i32
    return %c0_i32, %c0_i32_0 : i32, i32
  }
  func.func @transform_7(%arg0: i32) -> (i32, i32, i32) {
    %c0_i32 = arith.constant 0 : i32
    %c0_i32_0 = arith.constant 0 : i32
    %c0_i32_1 = arith.constant 0 : i32
    %c0_i32_2 = arith.constant 0 : i32
    return %c0_i32, %c0_i32_0, %c0_i32_1 : i32, i32, i32
  }
  func.func @transform_8(%arg0: i32) -> (i32, i32, i32) {
    %c0_i32 = arith.constant 0 : i32
    %c0_i32_0 = arith.constant 0 : i32
    %c0_i32_1 = arith.constant 0 : i32
    %c0_i32_2 = arith.constant 0 : i32
    return %c0_i32, %c0_i32_0, %c0_i32_1 : i32, i32, i32
  }
  func.func @transform_9(%arg0: i32) -> (i32, i32) {
    %c0_i32 = arith.constant 0 : i32
    %c0_i32_0 = arith.constant 0 : i32
    %c0_i32_1 = arith.constant 0 : i32
    return %c0_i32, %c0_i32_0 : i32, i32
  }
  func.func @transform_10(%arg0: i32) -> (i32, i32) {
    %c0_i32 = arith.constant 0 : i32
    %c0_i32_0 = arith.constant 0 : i32
    %c0_i32_1 = arith.constant 0 : i32
    return %c0_i32, %c0_i32_0 : i32, i32
  }
  func.func @transform_11(%arg0: i32) -> (i32, i32, i32) {
    %c0_i32 = arith.constant 0 : i32
    %c0_i32_0 = arith.constant 0 : i32
    %c0_i32_1 = arith.constant 0 : i32
    %c0_i32_2 = arith.constant 0 : i32
    return %c0_i32, %c0_i32_0, %c0_i32_1 : i32, i32, i32
  }
  func.func @transform_12(%arg0: i32) -> (i32, i32) {
    %c0_i32 = arith.constant 0 : i32
    %c0_i32_0 = arith.constant 0 : i32
    %c0_i32_1 = arith.constant 0 : i32
    return %c0_i32, %c0_i32_0 : i32, i32
  }
  func.func @transform_13(%arg0: i32) -> (i32, i32) {
    %c0_i32 = arith.constant 0 : i32
    %c0_i32_0 = arith.constant 0 : i32
    %c0_i32_1 = arith.constant 0 : i32
    return %c0_i32, %c0_i32_0 : i32, i32
  }
  func.func @transform_14(%arg0: i32) -> (i32, i32, i32) {
    %c0_i32 = arith.constant 0 : i32
    %c0_i32_0 = arith.constant 0 : i32
    %c0_i32_1 = arith.constant 0 : i32
    return %arg0, %c0_i32, %c0_i32_0 : i32, i32, i32
  }
}

</mosaic_0001>

<bundles_post_ra>
// kernel: upconv_forward.1
= control target key start
LH: loop header
LB: loop body
LE: loop exit
PB: predicated region body
PF: predicated region fallthrough
CT: control target
= control target key end

     0   :  { %s1301_s29 = smov 0   ;;  %s1739_s0 = inlined_call_operand.vmem [shape: f32[2,8,64], index: 0, kind: input, shape index: {}]   ;;  %s1740_s1 = inlined_call_operand.vmem [shape: f32[2,16,64], index: 1, kind: input, shape index: {}]   ;;  %s1741_s2 = inlined_call_operand.vmem [shape: f32[16,8], index: 2, kind: input, shape index: {}]   ;;  %s1742_s3 = inlined_call_operand.vmem [shape: f32[32,64], index: 3, kind: input, shape index: {}]   ;;  %s1743_s4 = inlined_call_operand.vmem [shape: f32[64,32], index: 4, kind: input, shape index: {}]   ;;  %s1744_s5 = inlined_call_operand.vmem [shape: f32[1,32], index: 5, kind: input, shape index: {}]   ;;  %s1745_s6 = inlined_call_operand.vmem [shape: f32[1,32], index: 6, kind: input, shape index: {}]   ;;  %s1746_s7 = inlined_call_operand.vmem [shape: f32[3,64,128], index: 7, kind: input, shape index: {}]   ;;  %s1747_s8 = inlined_call_operand.vmem [shape: f32[3,64,128], index: 8, kind: input, shape index: {}]   ;;  %s1748_s9 = inlined_call_operand.vmem [shape: f32[1,128], index: 9, kind: input, shape index: {}]   ;;  %s1749_s10 = inlined_call_operand.vmem [shape: f32[1,128], index: 10, kind: input, shape index: {}]   ;;  %s1750_s11 = inlined_call_operand.vmem [shape: f32[3,128,128], index: 11, kind: input, shape index: {}]   ;;  %s1751_s12 = inlined_call_operand.vmem [shape: f32[1,128], index: 12, kind: input, shape index: {}]   ;;  %s1752_s13 = inlined_call_operand.vmem [shape: f32[1,128], index: 13, kind: input, shape index: {}]   ;;  %s1753_s14 = inlined_call_operand.vmem [shape: f32[2,16,128], index: 14, kind: output, shape index: {}]  }
   0x1 LB: > { %s1107_s30 = sadd.s32 4294967295, %s1223_s29   ;;  %p1111_p0 = scmp.ge.s32.totalorder %s1223_s29, 1  ;;  %s1223_s29 = sphi %s1301_s29, %s24_s29  }
   0x2   : > { %p421_p1 = scmp.lt.s32.totalorder %s1223_s29, 3 }
   0x4   : > { %p422_p2 = pnand %p1111_p0, %p421_p1 }
   0x5   : > { %p471_p3 = scmp.lt.s32.totalorder (!%p422_p2), %s1107_s30, 1 }
   0x6   : > { %425 = sbr.rel (%p422_p2) target bundleno = 757 (0x2f5), region = 76 }
   0xb   : > { %v493_v0 = vld [vmem:[%s1743_s4 + $0x38] sm:$0xff]  ;;  %v492_v1 = vld [vmem:[%s1743_s4 + $0x30] sm:$0xff]  ;;  %vm494_vm0 = vcmask 523264   ;;  %v1225_v2 = vmov 0.0   ;;  %v491_v3 = vld [vmem:[%s1743_s4 + $0x28] sm:$0xff]  ;;  %s1755_s30 = smov (!%p471_p3, %s1107_s30), 1 }
   0xc   : > { %506 = vmatpush.msra.mxu0 %v493_v0  ;;  %595 = vst.msk [vmem:[#allocation2] sm:$0xff] %vm494_vm0, %v1225_v2  ;;  %v490_v4 = vld [vmem:[%s1743_s4 + $0x20] sm:$0xff]  ;;  %s1200_s23 = sshll.u32 %s1755_s30, 4  ;;  %v489_v5 = vld [vmem:[%s1743_s4 + $0x18] sm:$0xff]  ;;  %s1112_s15 = sshll.u32 %s1755_s30, 3  ;;  %v488_v7 = vld [vmem:[%s1743_s4 + $0x10] sm:$0xff] }
   0xd   : > { %596 = vst.msk [vmem:[#allocation2 + $0x8] sm:$0xff] %vm494_vm0, %v1225_v2  ;;  %s1337_s26 = scalar_lea.vmem %s1740_s1, %s1200_s23  ;;  %v487_v8 = vld [vmem:[%s1743_s4 + $0x8] sm:$0xff]  ;;  %s474_s22 = scalar_lea.vmem %s1739_s0, %s1112_s15  ;;  %v486_v9 = vld [vmem:[%s1743_s4] sm:$0xff]  ;;  %v564_v11 = vld [vmem:[%s1742_s3 + $0x18] sm:$0xff]  ;;  %vm531_vm1 = vcmask 64512   ;;  %vm565_vm2 = vcmask 261120  }
   0xe   : > { %507 = vmatpush.msra.mxu0 %v492_v1  ;;  %599 = vst.msk [vmem:[#allocation3] sm:$0xff] %vm494_vm0, %v1225_v2  ;;  %v602_v6 = vld [vmem:[%s1337_s26] sm:$0xff]  ;;  %v563_v12 = vld [vmem:[%s1742_s3 + $0x10] sm:$0xff]  ;;  %584 = vmatpush.msra.mxu2 %v564_v11  ;;  %v562_v13 = vld [vmem:[%s1742_s3 + $0x8] sm:$0xff]  ;;  %vm597_vm3 = vcmask 517120   ;;  %vm698_vm4 = vcmask 1046528   ;;  %s484_s27 = scalar_lea.vmem %s1753_s14, %s1200_s23 }
   0xf   : > { %600 = vst.msk [vmem:[#allocation3 + $0x8] sm:$0xff] %vm494_vm0, %v1225_v2  ;;  %v485_v10 = vld [vmem:[%s474_s22] sm:$0xff]  ;;  %v530_v21 = vld [vmem:[%s1741_s2 + $0x8] sm:$0xff]  ;;  %v621_v23 = vld [vmem:[%s1746_s7 + $0x38] sm:$0xff]  ;;  %vm786_vm5 = vcmask 1045504  }
  0x10   : > { %508 = vmatpush.msra.mxu0 %v491_v3  ;;  %878 = vst [vmem:[#allocation4] sm:$0xff] %v1225_v2  ;;  %585 = vmatpush.msra.mxu2 %v563_v12  ;;  %v1211_v14 = vld [vmem:[%s1744_s5] ss:$0 sm:$0xff]  ;;  %v620_v24 = vld [vmem:[%s1746_s7 + $0x30] sm:$0xff]  ;;  %v629_v25 = vld [vmem:[%s1747_s8 + $0x38] sm:$0xff] }
  0x11   : > { %879 = vst [vmem:[#allocation4 + $0x8] sm:$0xff] %v1225_v2  ;;  %v1212_v15 = vld [vmem:[%s1745_s6] ss:$0 sm:$0xff]  ;;  %v628_v26 = vld [vmem:[%s1747_s8 + $0x30] sm:$0xff]  ;;  %v619_v27 = vld [vmem:[%s1746_s7 + $0x28] sm:$0xff]  ;;  %644 = vmatpush.msra.mxu3 %v629_v25 }
  0x12   : > { %509 = vmatpush.msra.mxu0 %v490_v4  ;;  %604 = vst.msk [vmem:[#allocation2 + $0x1] sm:$0xff] %vm494_vm0, %v602_v6  ;;  %586 = vmatpush.msra.mxu2 %v562_v13  ;;  %v529_v20 = vld [vmem:[%s1741_s2] sm:$0xff]  ;;  %v1133_v28 = vld [vmem:[%s1746_s7 + $0x78] sm:$0xff]  ;;  %v627_v29 = vld [vmem:[%s1747_s8 + $0x28] sm:$0xff] }
  0x13   : > { %880 = vst [vmem:[#allocation4 + $0x10] sm:$0x3] %v1225_v2  ;;  %v561_v22 = vld [vmem:[%s1742_s3] sm:$0xff]  ;;  %v1132_v30 = vld [vmem:[%s1746_s7 + $0x70] sm:$0xff]  ;;  %645 = vmatpush.msra.mxu3 %v628_v26  ;;  %v617_v32 = vld [vmem:[%s1746_s7 + $0x18] sm:$0xff] }
  0x14   : > { %510 = vmatpush.msra.mxu0 %v489_v5  ;;  %587 = vmatpush.msra.mxu2 %v561_v22  ;;  %v618_v31 = vld [vmem:[%s1746_s7 + $0x20] sm:$0xff]  ;;  %v616_v33 = vld [vmem:[%s1746_s7 + $0x10] sm:$0xff]  ;;  %v603_v36 = vld [vmem:[%s1337_s26 + $0x8] sm:$0xff]  ;;  %598 = vst.msk [vmem:[#allocation2 + $0x10] sm:$0x3] %vm597_vm3, %v1225_v2 }
  0x15   : > { %646 = vmatpush.msra.mxu3 %v627_v29  ;;  %v626_v37 = vld [vmem:[%s1747_s8 + $0x20] sm:$0xff]  ;;  %v1131_v38 = vld [vmem:[%s1746_s7 + $0x68] sm:$0xff]  ;;  %601 = vst.msk [vmem:[#allocation3 + $0x10] sm:$0x3] %vm597_vm3, %v1225_v2  ;;  %v625_v40 = vld [vmem:[%s1747_s8 + $0x18] sm:$0xff] }
  0x16   : > { %511 = vmatpush.msra.mxu0 %v488_v7  ;;  %716 = vmatpush.msrb.mxu2 %v1133_v28  ;;  %v615_v39 = vld [vmem:[%s1746_s7 + $0x8] sm:$0xff]  ;;  %v614_v41 = vld [vmem:[%s1746_s7] sm:$0xff]  ;;  %605 = vst.msk [vmem:[#allocation2 + $0x9] sm:$0xff] %vm494_vm0, %v603_v36  ;;  %v624_v43 = vld [vmem:[%s1747_s8 + $0x10] sm:$0xff] }
  0x17   : > { %647 = vmatpush.msra.mxu3 %v626_v37  ;;  %v1130_v42 = vld [vmem:[%s1746_s7 + $0x60] sm:$0xff]  ;;  %v1129_v45 = vld [vmem:[%s1746_s7 + $0x58] sm:$0xff]  ;;  %v623_v47 = vld [vmem:[%s1747_s8 + $0x8] sm:$0xff] }
  0x18   : > { %512 = vmatpush.msra.mxu0 %v487_v8  ;;  %717 = vmatpush.msrb.mxu2 %v1132_v30  ;;  %v1143_v46 = vld [vmem:[%s1747_s8 + $0x78] sm:$0xff]  ;;  %v1128_v48 = vld [vmem:[%s1746_s7 + $0x50] sm:$0xff]  ;;  %v622_v51 = vld [vmem:[%s1747_s8] sm:$0xff] }
  0x19   : > { %648 = vmatpush.msra.mxu3 %v625_v40  ;;  %v1443_v44 = vld [vmem:[#allocation2] sm:$0xff]  ;;  %v1142_v49 = vld [vmem:[%s1747_s8 + $0x70] sm:$0xff]  ;;  %v1127_v52 = vld [vmem:[%s1746_s7 + $0x48] sm:$0xff] }
  0x1a   : > { %513 = vmatpush.msra.mxu0 %v486_v9  ;;  %718 = vmatpush.msrb.mxu2 %v1131_v38  ;;  %v699_v50 = vrot.slane %v1443_v44, 1  ;;  %v1141_v53 = vld [vmem:[%s1747_s8 + $0x68] sm:$0xff]  ;;  %v1126_v55 = vld [vmem:[%s1746_s7 + $0x40] sm:$0xff]  ;;  %v1153_v57 = vld [vmem:[%s1746_s7 + $0xb8] sm:$0xff] }
  0x1b   : > { %1117 = vmatmul.msk.f32.vlgmr.msra.gmra.mxu0 %vm494_vm0, %v485_v10  ;;  %649 = vmatpush.msra.mxu3 %v624_v43  ;;  %v1140_v56 = vld [vmem:[%s1747_s8 + $0x60] sm:$0xff]  ;;  %v1139_v59 = vld [vmem:[%s1747_s8 + $0x58] sm:$0xff]  ;;  %v1152_v60 = vld [vmem:[%s1746_s7 + $0xb0] sm:$0xff] }
  0x1c   : > { %719 = vmatpush.msrb.mxu2 %v1130_v42  ;;  %v1138_v62 = vld [vmem:[%s1747_s8 + $0x50] sm:$0xff]  ;;  %v1151_v63 = vld [vmem:[%s1746_s7 + $0xa8] sm:$0xff]  ;;  %v1150_v1 = vld [vmem:[%s1746_s7 + $0xa0] sm:$0xff] }
  0x1d   : > { %650 = vmatpush.msra.mxu3 %v623_v47  ;;  %v1472_v54 = vld [vmem:[#allocation2 + $0x8] sm:$0xff]  ;;  %v610_v2 = vld [vmem:[#allocation2 + $0x10] sm:$0x3]  ;;  %v1136_v4 = vld [vmem:[%s1747_s8 + $0x40] sm:$0xff] }
  0x1e   : > { %720 = vmatpush.msrb.mxu2 %v1129_v45  ;;  %v700_v58 = vrot.slane %v1472_v54, 1  ;;  %v1137_v0 = vld [vmem:[%s1747_s8 + $0x48] sm:$0xff]  ;;  %v702_v3 = vrot.slane %v610_v2, 1  ;;  %v1149_v5 = vld [vmem:[%s1746_s7 + $0x98] sm:$0xff]  ;;  %v1148_v7 = vld [vmem:[%s1746_s7 + $0x90] sm:$0xff]  ;;  %v788_v25 = vrot.slane %v1472_v54, 2 }
  0x1f   : > { %651 = vmatpush.msra.mxu3 %v622_v51  ;;  %v1163_v8 = vld [vmem:[%s1747_s8 + $0xb8] sm:$0xff]  ;;  %v1147_v9 = vld [vmem:[%s1746_s7 + $0x88] sm:$0xff]  ;;  %v1162_v10 = vld [vmem:[%s1747_s8 + $0xb0] sm:$0xff]  ;;  %v790_v30 = vrot.slane %v610_v2, 2 }
  0x20   : > { %721 = vmatpush.msrb.mxu2 %v1128_v48  ;;  %v701_v61 = vsel %vm698_vm4, %v699_v50, %v700_v58  ;;  %v703_v6 = vsel %vm698_vm4, %v700_v58, %v702_v3  ;;  %v1146_v11 = vld [vmem:[%s1746_s7 + $0x80] sm:$0xff]  ;;  %v1161_v12 = vld [vmem:[%s1747_s8 + $0xa8] sm:$0xff]  ;;  %v901_v38 = vld [vmem:[%s1750_s11 + $0x78] sm:$0xff] }
  0x21   : > { %804 = vmatpush.msrb.mxu3 %v1153_v57  ;;  %v1160_v13 = vld [vmem:[%s1747_s8 + $0xa0] sm:$0xff]  ;;  %952 = vmatpush.msrb.mxu0 %v901_v38  ;;  %v899_v40 = vld [vmem:[%s1750_s11 + $0x68] sm:$0xff]  ;;  %v897_v42 = vld [vmem:[%s1750_s11 + $0x58] sm:$0xff] }
  0x22   : > { %722 = vmatpush.msrb.mxu2 %v1127_v52  ;;  %v896_v43 = vld [vmem:[%s1750_s11 + $0x50] sm:$0xff]  ;;  %v1181_v45 = vld [vmem:[%s1750_s11 + $0xf8] sm:$0xff]  ;;  %v895_v47 = vld [vmem:[%s1750_s11 + $0x48] sm:$0xff] }
  0x23   : > { %805 = vmatpush.msrb.mxu3 %v1152_v60  ;;  %v1180_v48 = vld [vmem:[%s1750_s11 + $0xf0] sm:$0xff]  ;;  %v894_v50 = vld [vmem:[%s1750_s11 + $0x40] sm:$0xff]  ;;  %v1179_v51 = vld [vmem:[%s1750_s11 + $0xe8] sm:$0xff] }
  0x24   : > { %723 = vmatpush.msrb.mxu2 %v1126_v55  ;;  %v1195_v52 = vld [vmem:[%s1750_s11 + $0x168] sm:$0xff]  ;;  %v1194_v55 = vld [vmem:[%s1750_s11 + $0x160] sm:$0xff]  ;;  %v1177_v57 = vld [vmem:[%s1750_s11 + $0xd8] sm:$0xff] }
  0x25   : > { %806 = vmatpush.msrb.mxu3 %v1151_v63  ;;  %v1193_v58 = vld [vmem:[%s1750_s11 + $0x158] sm:$0xff]  ;;  %v890_v63 = vld [vmem:[%s1750_s11 + $0x20] sm:$0xff] }
  0x26   : > { %v889_v2 = vld [vmem:[%s1750_s11 + $0x18] sm:$0xff]  ;;  %v1174_v3 = vld [vmem:[%s1750_s11 + $0xc0] sm:$0xff] }
  0x27   : > { %807 = vmatpush.msrb.mxu3 %v1150_v1  ;;  %v1191_v1 = vld [vmem:[%s1750_s11 + $0x148] sm:$0xff] }
  0x29   : > { %808 = vmatpush.msrb.mxu3 %v1149_v5 }
  0x2b   : > { %809 = vmatpush.msrb.mxu3 %v1148_v7  ;;  %v1173_v7 = vld [vmem:[%s1750_s11 + $0xb8] sm:$0xff] }
  0x2d   : > { %810 = vmatpush.msrb.mxu3 %v1147_v9  ;;  %v887_v9 = vld [vmem:[%s1750_s11 + $0x8] sm:$0xff] }
  0x2f   : > { %811 = vmatpush.msrb.mxu3 %v1146_v11  ;;  %v1188_v11 = vld [vmem:[%s1750_s11 + $0x130] sm:$0xff] }
  0x98   : > { %v515_v16 = vpop.f32.mrf.mxu0 }
  0x99   : > { %v522_v17 = vmul.f32 %v1211_v14, %v515_v16  ;;  %v1159_v14 = vld [vmem:[%s1747_s8 + $0x98] sm:$0xff]  ;;  %v1157_v16 = vld [vmem:[%s1747_s8 + $0x88] sm:$0xff] }
  0x9b   : > { %v527_v18 = vadd.f32 %v1212_v15, %v522_v17  ;;  %v1158_v15 = vld [vmem:[%s1747_s8 + $0x90] sm:$0xff] }
  0x9d   : > { %v528_v19 = vmax.f32 %v527_v18, 0.0  ;;  %v1156_v18 = vld [vmem:[%s1747_s8 + $0x80] sm:$0xff] }
  0x9f   : > { %553 = vmatpush.msra.mxu1 %v528_v19 }
  0xa0   : > { %1118 = vmatmul.msk.f32.vlgmr.msra.gmra.mxu1 %vm531_vm1, %v529_v20 }
  0xa1   : > { %673 = vmatpush.msrb.mxu1 %v621_v23 }
  0xa3   : > { %674 = vmatpush.msrb.mxu1 %v620_v24  ;;  %v787_v24 = vrot.slane %v1443_v44, 2 }
  0xa5   : > { %675 = vmatpush.msrb.mxu1 %v619_v27  ;;  %v789_v28 = vsel %vm786_vm5, %v787_v24, %v788_v25 }
  0xa7   : > { %676 = vmatpush.msrb.mxu1 %v618_v31 }
  0xa8   : > { %1119 = vmatmul.msk.f32.gmra.mxu1 %vm531_vm1, %v530_v21 }
  0xa9   : > { %677 = vmatpush.msrb.mxu1 %v617_v32  ;;  %v791_v32 = vsel %vm786_vm5, %v788_v25, %v790_v30  ;;  %v1167_v25 = vld [vmem:[%s1750_s11 + $0x88] sm:$0xff]  ;;  %v1182_v30 = vld [vmem:[%s1750_s11 + $0x100] sm:$0xff] }
  0xab   : > { %678 = vmatpush.msrb.mxu1 %v616_v33 }
  0xad   : > { %679 = vmatpush.msrb.mxu1 %v615_v39  ;;  %v900_v39 = vld [vmem:[%s1750_s11 + $0x70] sm:$0xff] }
  0xae   : > { %953 = vmatpush.msrb.mxu0 %v900_v39 }
  0xaf   : > { %680 = vmatpush.msrb.mxu1 %v614_v41  ;;  %v898_v41 = vld [vmem:[%s1750_s11 + $0x60] sm:$0xff] }
  0xb0   : > { %1124 = vmatmul.msk.f32.vlgmr.msrb.gmra.mxu1 %vm494_vm0, %v1443_v44  ;;  %954 = vmatpush.msrb.mxu0 %v899_v40  ;;  %v1214_v40 = vld [vmem:[%s1749_s10] ss:$0 sm:$0xff] }
  0xb1   : > { %760 = vmatpush.msra.mxu1 %v1143_v46  ;;  %v1197_v46 = vld [vmem:[%s1750_s11 + $0x178] sm:$0xff] }
  0xb2   : > { %955 = vmatpush.msrb.mxu0 %v898_v41 }
  0xb3   : > { %761 = vmatpush.msra.mxu1 %v1142_v49  ;;  %v1196_v49 = vld [vmem:[%s1750_s11 + $0x170] sm:$0xff] }
  0xb4   : > { %956 = vmatpush.msrb.mxu0 %v897_v42 }
  0xb5   : > { %762 = vmatpush.msra.mxu1 %v1141_v53  ;;  %v893_v53 = vld [vmem:[%s1750_s11 + $0x38] sm:$0xff] }
  0xb6   : > { %957 = vmatpush.msrb.mxu0 %v896_v43 }
  0xb7   : > { %763 = vmatpush.msra.mxu1 %v1140_v56  ;;  %v892_v56 = vld [vmem:[%s1750_s11 + $0x30] sm:$0xff] }
  0xb8   : > { %1125 = vmatmul.msk.f32.gmra.mxu1 %vm494_vm0, %v1472_v54  ;;  %958 = vmatpush.msrb.mxu0 %v895_v47  ;;  %v1178_v54 = vld [vmem:[%s1750_s11 + $0xe0] sm:$0xff] }
  0xb9   : > { %764 = vmatpush.msra.mxu1 %v1139_v59  ;;  %v891_v59 = vld [vmem:[%s1750_s11 + $0x28] sm:$0xff] }
  0xba   : > { %959 = vmatpush.msrb.mxu0 %v894_v50 }
  0xbb   : > { %765 = vmatpush.msra.mxu1 %v1138_v62  ;;  %v1192_v62 = vld [vmem:[%s1750_s11 + $0x150] sm:$0xff] }
  0xbc   : > { %960 = vmatpush.msrb.mxu0 %v893_v53 }
  0xbd   : > { %766 = vmatpush.msra.mxu1 %v1137_v0  ;;  %v1175_v0 = vld [vmem:[%s1750_s11 + $0xc8] sm:$0xff] }
  0xbe   : > { %961 = vmatpush.msrb.mxu0 %v892_v56 }
  0xbf   : > { %767 = vmatpush.msra.mxu1 %v1136_v4  ;;  %v1190_v4 = vld [vmem:[%s1750_s11 + $0x140] sm:$0xff] }
  0xc0   : > { %962 = vmatpush.msrb.mxu0 %v891_v59 }
  0xc1   : > { %847 = vmatpush.msrb.mxu1 %v1163_v8  ;;  %v1189_v8 = vld [vmem:[%s1750_s11 + $0x138] sm:$0xff] }
  0xc2   : > { %963 = vmatpush.msrb.mxu0 %v890_v63 }
  0xc3   : > { %848 = vmatpush.msrb.mxu1 %v1162_v10  ;;  %v1172_v10 = vld [vmem:[%s1750_s11 + $0xb0] sm:$0xff] }
  0xc4   : > { %964 = vmatpush.msrb.mxu0 %v889_v2 }
  0xc5   : > { %849 = vmatpush.msrb.mxu1 %v1161_v12  ;;  %v886_v12 = vld [vmem:[%s1750_s11] sm:$0xff] }
  0xc7   : > { %850 = vmatpush.msrb.mxu1 %v1160_v13 }
  0xc9   : > { %851 = vmatpush.msrb.mxu1 %v1159_v14  ;;  %v1171_v14 = vld [vmem:[%s1750_s11 + $0xa8] sm:$0xff] }
  0xcb   : > { %852 = vmatpush.msrb.mxu1 %v1158_v15  ;;  %v1187_v15 = vld [vmem:[%s1750_s11 + $0x128] sm:$0xff] }
  0xcd   : > { %853 = vmatpush.msrb.mxu1 %v1157_v16  ;;  %v1170_v16 = vld [vmem:[%s1750_s11 + $0xa0] sm:$0xff] }
  0xcf   : > { %854 = vmatpush.msrb.mxu1 %v1156_v18  ;;  %v1169_v18 = vld [vmem:[%s1750_s11 + $0x98] sm:$0xff] }
 0x11d   : > { %v555_v34 = vpop.f32.mrf.mxu1 }
 0x11e   : > { %1120 = vmatmul.msk.f32.vlgmr.msra.gmra.mxu2 %vm565_vm2, %v555_v34 }
 0x11f   : > { %929 = vmatpush.msra.mxu2 %v1181_v45 }
 0x121   : > { %930 = vmatpush.msra.mxu2 %v1180_v48 }
 0x123   : > { %931 = vmatpush.msra.mxu2 %v1179_v51 }
 0x125   : > { %v558_v35 = vpop.f32.mrf.mxu1  ;;  %932 = vmatpush.msra.mxu2 %v1178_v54 }
 0x126   : > { %1121 = vmatmul.msk.f32.gmra.mxu2 %vm565_vm2, %v558_v35 }
 0x127   : > { %933 = vmatpush.msra.mxu2 %v1177_v57 }
 0x12d   : > { %v1583_v44 = vpop.f32.mrf.mxu1 }
 0x12e   : > { %1134 = vmatmul.msk.f32.vlgmr.msrb.gmra.mxu2 %vm494_vm0, %v701_v61  ;;  %v1176_v61 = vld [vmem:[%s1750_s11 + $0xd0] sm:$0xff] }
 0x12f   : > { %934 = vmatpush.msra.mxu2 %v1176_v61 }
 0x131   : > { %935 = vmatpush.msra.mxu2 %v1175_v0 }
 0x133   : > { %936 = vmatpush.msra.mxu2 %v1174_v3 }
 0x135   : > { %v1630_v60 = vpop.f32.mrf.mxu1  ;;  %937 = vmatpush.msra.mxu2 %v1173_v7  ;;  %v1216_v7 = vld [vmem:[%s1752_s13] ss:$0 sm:$0xff] }
 0x136   : > { %1135 = vmatmul.msk.f32.gmra.mxu2 %vm494_vm0, %v703_v6  ;;  %v888_v6 = vld [vmem:[%s1750_s11 + $0x10] sm:$0xff] }
 0x137   : > { %965 = vmatpush.msrb.mxu0 %v888_v6  ;;  %938 = vmatpush.msra.mxu2 %v1172_v10 }
 0x139   : > { %966 = vmatpush.msrb.mxu0 %v887_v9  ;;  %939 = vmatpush.msra.mxu2 %v1171_v14 }
 0x13b   : > { %967 = vmatpush.msrb.mxu0 %v886_v12  ;;  %940 = vmatpush.msra.mxu2 %v1170_v16 }
 0x13d   : > { %941 = vmatpush.msra.mxu2 %v1169_v18 }
 0x1a1   : > { %v589_v17 = vpop.f32.mrf.mxu2 }
 0x1a2   : > { %606 = vst.msk [vmem:[#allocation3 + $0x1] sm:$0xff] %vm494_vm0, %v589_v17  ;;  %v1186_v17 = vld [vmem:[%s1750_s11 + $0x120] sm:$0xff] }
 0x1a9   : > { %v592_v19 = vpop.f32.mrf.mxu2  ;;  %v611_v20 = vld [vmem:[#allocation3] sm:$0xff] }
 0x1aa   : > { %607 = vst.msk [vmem:[#allocation3 + $0x9] sm:$0xff] %vm494_vm0, %v592_v19  ;;  %1122 = vmatmul.msk.f32.vlgmr.msra.gmra.mxu3 %vm494_vm0, %v611_v20  ;;  %v743_v22 = vrot.slane %v611_v20, 1  ;;  %v830_v34 = vrot.slane %v611_v20, 2  ;;  %v1185_v19 = vld [vmem:[%s1750_s11 + $0x118] sm:$0xff] }
 0x1ab   : > { %999 = vmatpush.msra.mxu3 %v1197_v46 }
 0x1ad   : > { %1000 = vmatpush.msra.mxu3 %v1196_v49 }
 0x1af   : > { %1001 = vmatpush.msra.mxu3 %v1195_v52 }
 0x1b1   : > { %v612_v21 = vld [vmem:[#allocation3 + $0x8] sm:$0xff]  ;;  %v613_v27 = vld [vmem:[#allocation3 + $0x10] sm:$0x3]  ;;  %1002 = vmatpush.msra.mxu3 %v1194_v55 }
 0x1b2   : > { %1123 = vmatmul.msk.f32.gmra.mxu3 %vm494_vm0, %v612_v21  ;;  %v744_v23 = vrot.slane %v612_v21, 1  ;;  %v746_v29 = vrot.slane %v613_v27, 1  ;;  %v831_v33 = vrot.slane %v612_v21, 2  ;;  %v833_v36 = vrot.slane %v613_v27, 2  ;;  %v725_v21 = vpop.f32.mrf.mxu2  ;;  %v1183_v27 = vld [vmem:[%s1750_s11 + $0x108] sm:$0xff] }
 0x1b3   : > { %1003 = vmatpush.msra.mxu3 %v1193_v58 }
 0x1b4   : > { %v745_v26 = vsel %vm698_vm4, %v743_v22, %v744_v23  ;;  %v747_v31 = vsel %vm698_vm4, %v744_v23, %v746_v29  ;;  %v832_v35 = vsel %vm786_vm5, %v830_v34, %v831_v33  ;;  %v834_v37 = vsel %vm786_vm5, %v831_v33, %v833_v36  ;;  %v1168_v22 = vld [vmem:[%s1750_s11 + $0x90] sm:$0xff]  ;;  %v1166_v29 = vld [vmem:[%s1750_s11 + $0x80] sm:$0xff] }
 0x1b5   : > { %1144 = vmatmul.msk.f32.vlgmr.msra.gmra.mxu1 %vm494_vm0, %v745_v26  ;;  %1004 = vmatpush.msra.mxu3 %v1192_v62  ;;  %v1184_v23 = vld [vmem:[%s1750_s11 + $0x110] sm:$0xff]  ;;  %v1213_v36 = vld [vmem:[%s1748_s9] ss:$0 sm:$0xff] }
 0x1b6   : > { %942 = vmatpush.msra.mxu2 %v1168_v22 }
 0x1b7   : > { %1005 = vmatpush.msra.mxu3 %v1191_v1 }
 0x1b8   : > { %943 = vmatpush.msra.mxu2 %v1167_v25 }
 0x1b9   : > { %1006 = vmatpush.msra.mxu3 %v1190_v4 }
 0x1ba   : > { %1154 = vmatmul.msk.f32.vlgmr.msrb.gmra.mxu3 %vm494_vm0, %v789_v28  ;;  %944 = vmatpush.msra.mxu2 %v1166_v29  ;;  %v728_v34 = vpop.f32.mrf.mxu2 }
 0x1bb   : > { %1007 = vmatpush.msra.mxu3 %v1189_v8 }
 0x1bd   : > { %1145 = vmatmul.msk.f32.gmra.mxu1 %vm494_vm0, %v747_v31  ;;  %1008 = vmatpush.msra.mxu3 %v1188_v11 }
 0x1bf   : > { %1009 = vmatpush.msra.mxu3 %v1187_v15 }
 0x1c1   : > { %1010 = vmatpush.msra.mxu3 %v1186_v17 }
 0x1c2   : > { %1155 = vmatmul.msk.f32.gmra.mxu3 %vm494_vm0, %v791_v32 }
 0x1c3   : > { %1011 = vmatpush.msra.mxu3 %v1185_v19 }
 0x1c5   : > { %1164 = vmatmul.msk.f32.vlgmr.msrb.gmra.mxu1 %vm494_vm0, %v832_v35  ;;  %1012 = vmatpush.msra.mxu3 %v1184_v23 }
 0x1c7   : > { %1013 = vmatpush.msra.mxu3 %v1183_v27 }
 0x1c9   : > { %1014 = vmatpush.msra.mxu3 %v1182_v30 }
 0x1cd   : > { %1165 = vmatmul.msk.f32.gmra.mxu1 %vm494_vm0, %v834_v37 }
 0x22d   : > { %v653_v5 = vpop.f32.mrf.mxu3 }
 0x22e   : > { %v683_v24 = vadd.f32 %v1583_v44, %v653_v5  ;;  %v1215_v5 = vld [vmem:[%s1751_s12] ss:$0 sm:$0xff] }
 0x230   : > { %v731_v28 = vadd.f32 %v725_v21, %v683_v24 }
 0x232   : > { %v769_v13 = vpop.f32.mrf.mxu1 }
 0x233   : > { %v775_v32 = vadd.f32 %v769_v13, %v731_v28 }
 0x235   : > { %v656_v20 = vpop.f32.mrf.mxu3 }
 0x236   : > { %v686_v33 = vadd.f32 %v1630_v60, %v656_v20 }
 0x238   : > { %v732_v38 = vadd.f32 %v728_v34, %v686_v33 }
 0x23a   : > { %v772_v26 = vpop.f32.mrf.mxu1 }
 0x23b   : > { %v776_v43 = vadd.f32 %v772_v26, %v732_v38 }
 0x23d   : > { %v813_v31 = vpop.f32.mrf.mxu3 }
 0x23e   : > { %v819_v35 = vadd.f32 %v813_v31, %v775_v32 }
 0x242   : > { %v856_v37 = vpop.f32.mrf.mxu1 }
 0x243   : > { %v862_v39 = vadd.f32 %v856_v37, %v819_v35 }
 0x245   : > { %v868_v41 = vmul.f32 %v1213_v36, %v862_v39  ;;  %v816_v42 = vpop.f32.mrf.mxu3 }
 0x246   : > { %v820_v46 = vadd.f32 %v816_v42, %v776_v43 }
 0x247   : > { %v874_v44 = vadd.f32 %v1214_v40, %v868_v41 }
 0x249   : > { %v876_v45 = vmax.f32 %v874_v44, 0.0 }
 0x24a   : > { %v859_v47 = vpop.f32.mrf.mxu1 }
 0x24b   : > { %881 = vst [vmem:[#allocation4 + $0x1] sm:$0xff] %v876_v45  ;;  %v863_v48 = vadd.f32 %v859_v47, %v820_v46 }
 0x24d   : > { %v869_v49 = vmul.f32 %v1213_v36, %v863_v48 }
 0x24f   : > { %v875_v50 = vadd.f32 %v1214_v40, %v869_v49 }
 0x251   : > { %v877_v51 = vmax.f32 %v875_v50, 0.0 }
 0x252   : > { %v883_v52 = vld [vmem:[#allocation4] sm:$0xff] }
 0x253   : > { %882 = vst [vmem:[#allocation4 + $0x9] sm:$0xff] %v877_v51  ;;  %968 = vmatmul.f32.vlgmr.msrb.gmra.mxu0 %v883_v52  ;;  %v922_v54 = vrot.slane %v883_v52, 1  ;;  %v992_v55 = vrot.slane %v883_v52, 2 }
 0x25a   : > { %v884_v53 = vld [vmem:[#allocation4 + $0x8] sm:$0xff]  ;;  %v885_v60 = vld [vmem:[#allocation4 + $0x10] sm:$0x3] }
 0x25b   : > { %v923_v56 = vrot.slane %v884_v53, 1  ;;  %971 = vmatmul.f32.gmra.mxu0 %v884_v53  ;;  %v993_v57 = vrot.slane %v884_v53, 2  ;;  %v925_v61 = vrot.slane %v885_v60, 1  ;;  %v995_v62 = vrot.slane %v885_v60, 2 }
 0x25d   : > { %v924_v58 = vsel %vm698_vm4, %v922_v54, %v923_v56  ;;  %v994_v59 = vsel %vm786_vm5, %v992_v55, %v993_v57  ;;  %v926_v63 = vsel %vm698_vm4, %v923_v56, %v925_v61  ;;  %v996_v0 = vsel %vm786_vm5, %v993_v57, %v995_v62 }
 0x25e   : > { %945 = vmatmul.f32.vlgmr.msra.gmra.mxu2 %v924_v58  ;;  %1015 = vmatmul.f32.vlgmr.msra.gmra.mxu3 %v994_v59 }
 0x266   : > { %948 = vmatmul.f32.gmra.mxu2 %v926_v63  ;;  %1018 = vmatmul.f32.gmra.mxu3 %v996_v0 }
 0x2d0   : > { %v969_v1 = vpop.f32.mrf.mxu0 }
 0x2d8   : > { %v972_v10 = vpop.f32.mrf.mxu0 }
 0x2e1   : > { %v946_v2 = vpop.f32.mrf.mxu2  ;;  %v1016_v3 = vpop.f32.mrf.mxu3 }
 0x2e2   : > { %v970_v4 = vadd.f32 %v969_v1, %v946_v2 }
 0x2e4   : > { %v1022_v6 = vadd.f32 %v1016_v3, %v970_v4 }
 0x2e6   : > { %v1028_v8 = vmul.f32 %v1215_v5, %v1022_v6 }
 0x2e8   : > { %v1034_v9 = vadd.f32 %v1216_v7, %v1028_v8 }
 0x2e9   : > { %v949_v11 = vpop.f32.mrf.mxu2  ;;  %v1019_v14 = vpop.f32.mrf.mxu3 }
 0x2ea   : > { %v1036_v12 = vmax.f32 %v1034_v9, 0.0  ;;  %v973_v13 = vadd.f32 %v972_v10, %v949_v11 }
 0x2ec   : > { %1038 = vst [vmem:[%s484_s27] sm:$0xff] %v1036_v12  ;;  %v1023_v15 = vadd.f32 %v1019_v14, %v973_v13 }
 0x2ee   : > { %v1029_v16 = vmul.f32 %v1215_v5, %v1023_v15 }
 0x2f0   : > { %v1035_v17 = vadd.f32 %v1216_v7, %v1029_v16 }
 0x2f2   : > { %v1037_v18 = vmax.f32 %v1035_v17, 0.0 }
 0x2f4   : > { %1039 = vst [vmem:[%s484_s27 + $0x8] sm:$0xff] %v1037_v18 }
 0x2f5 PF: > { %s24_s29 = sadd.s32 1, %s1223_s29  }
 0x2f6   : > { %p21_p4 = scmp.ge.s32.totalorder %s24_s29, 4  }
 0x2f8   :  { %23 = sbr.rel (!%p21_p4) target bundleno = 1 (0x1), region = 115 }

</bundles_post_ra>
